<compile_context>
chip_gen: v5e
topology: v5e:2x2
jax: 0.10.0
libtpu: 0.0.40
codegen_flags: <defaults>
</compile_context>

<pallas_src>
import jax
import jax.numpy as jnp
from jax.experimental import pallas as pl
from jax.experimental.pallas import tpu as pltpu

EPS = 1e-5

# f32 keeps the demo comfortably inside the reference tolerance.
# TODO(synk): at real ResNet widths, switch MATMUL_DTYPE to jnp.bfloat16 on
# v6e/v7x (accumulation stays f32 via preferred_element_type) and tile H with
# a 1-row halo instead of keeping a whole image per grid step.
MATMUL_DTYPE = jnp.float32


# ---------------------------------------------------------------------------
# Kernels
# ---------------------------------------------------------------------------
def _conv_body(x_f32, a_ref, z_ref, s_ref, ss_ref):
  """Shared 3x3-conv tail: x_f32 is the (H, W*C) activated input block."""
  H = z_ref.shape[1]
  WC = z_ref.shape[2]

  # One lane-dense (H, W*C) x (W*C, 3*W*C) MXU matmul produces all three
  # H-direction tap images at once (f32 accumulation); the lane slices below
  # fall on 128-lane boundaries so they are free views.
  y = jnp.dot(x_f32.astype(MATMUL_DTYPE), a_ref[...],
              preferred_element_type=jnp.float32)
  y_top = y[:, 0:WC]
  y_mid = y[:, WC:2 * WC]
  y_bot = y[:, 2 * WC:3 * WC]

  # H-direction taps with padding=1:
  #   out[h] = y_top[h-1] + y_mid[h] + y_bot[h+1], zero rows at the borders.
  zero_row = jnp.zeros((1, WC), jnp.float32)
  acc = (y_mid
         + jnp.concatenate([zero_row, y_top[:H - 1]], axis=0)
         + jnp.concatenate([y_bot[1:], zero_row], axis=0))

  z_ref[0] = acc.astype(z_ref.dtype)
  # Per-image partial sums for the training-mode batch-norm statistics.
  s_ref[0] = jnp.sum(acc, axis=0, keepdims=True)
  ss_ref[0] = jnp.sum(acc * acc, axis=0, keepdims=True)


def _conv1_kernel(x_ref, a_ref, z_ref, s_ref, ss_ref):
  _conv_body(x_ref[0].astype(jnp.float32), a_ref, z_ref, s_ref, ss_ref)


def _conv2_kernel(z1_ref, a_ref, scale_ref, shift_ref, z_ref, s_ref, ss_ref):
  # BN1 (per-lane affine) + ReLU fused into conv2's input read.
  y = jnp.maximum(
      z1_ref[0].astype(jnp.float32) * scale_ref[...] + shift_ref[...], 0.0)
  _conv_body(y, a_ref, z_ref, s_ref, ss_ref)


def _bn_add_relu_kernel(z_ref, xid_ref, scale_ref, shift_ref, out_ref):
  # BN2 + residual add (identity = x, downsample=None) + ReLU.
  y = z_ref[0].astype(jnp.float32) * scale_ref[...] + shift_ref[...]
  out_ref[0] = jnp.maximum(y + xid_ref[0].astype(jnp.float32),
                           0.0).astype(out_ref.dtype)


# ---------------------------------------------------------------------------
# Wrapper helpers
# ---------------------------------------------------------------------------
def _band_weights(w_oihw, W):
  """OIHW 3x3 weights -> (W*Cin, 3*W*Cout) banded block-Toeplitz matrix.

  For each kernel row kh, A_kh[(w+kw-1)*Cin + ci, w*Cout + co] =
  w_oihw[co, ci, kh, kw]; entries that would index w+kw-1 outside [0, W) are
  dropped, which implements the W-side zero padding inside the matmul itself.
  The three A_kh are concatenated along the output axis so the kernel needs a
  single MXU matmul per image.
  """
  mats = []
  for kh in range(3):
    a = None
    for kw in range(3):
      shift = jnp.eye(W, W, k=1 - kw, dtype=w_oihw.dtype)
      term = jnp.kron(shift, w_oihw[:, :, kh, kw].T)
      a = term if a is None else a + term
    mats.append(a)
  return jnp.concatenate(mats, axis=1)           # (W*Cin, 3*W*Cout)


def _bn_affine(s_part, ss_part, gamma, beta, count, W, C):
  """Per-image partial sums -> per-lane (1, W*C) BN scale/shift vectors."""
  s = jnp.sum(s_part, axis=(0, 1)).reshape(W, C).sum(axis=0)     # (C,)
  ss = jnp.sum(ss_part, axis=(0, 1)).reshape(W, C).sum(axis=0)   # (C,)
  mean = s / count
  # Biased variance (matches PyTorch's normalization statistic in training).
  # TODO(synk): use a centered two-pass if activations grow large enough for
  # E[x^2]-E[x]^2 cancellation to matter.
  var = jnp.maximum(ss / count - mean * mean, 0.0)
  scale_c = gamma * jax.lax.rsqrt(var + EPS)
  shift_c = beta - mean * scale_c
  return jnp.tile(scale_c, W)[None, :], jnp.tile(shift_c, W)[None, :]


def _conv_call(kernel, inputs, N, H, WC):
  act_spec = pl.BlockSpec((1, H, WC), lambda n: (n, 0, 0))
  stat_spec = pl.BlockSpec((1, 1, WC), lambda n: (n, 0, 0))
  vec_spec = pl.BlockSpec((1, WC), lambda n: (0, 0))
  wgt_spec = pl.BlockSpec((WC, 3 * WC), lambda n: (0, 0))
  in_specs = ([act_spec, wgt_spec] + [vec_spec] * (len(inputs) - 2))
  return pl.pallas_call(
      kernel,
      grid=(N,),
      in_specs=in_specs,
      out_specs=(act_spec, stat_spec, stat_spec),
      out_shape=(jax.ShapeDtypeStruct((N, H, WC), jnp.float32),
                 jax.ShapeDtypeStruct((N, 1, WC), jnp.float32),
                 jax.ShapeDtypeStruct((N, 1, WC), jnp.float32)),
      compiler_params=pltpu.CompilerParams(
          dimension_semantics=("parallel",)),
  )(*inputs)


@jax.jit
def basic_block_pallas(x_nchw, w1_oihw, g1, b1, w2_oihw, g2, b2):
  """BasicBlock forward.  x_nchw: (N, C, H, W) f32; conv weights OIHW."""
  N, C, H, W = x_nchw.shape
  WC = W * C
  count = N * H * W

  # NCHW -> lane-dense row layout (N, H, W*C).  One boundary transpose kept so
  # the public signature matches the PyTorch module (an NHWC-native caller
  # could skip it and feed the row layout directly).
  x_rows = jnp.transpose(x_nchw, (0, 2, 3, 1)).reshape(N, H, WC)

  a1 = _band_weights(w1_oihw, W).astype(MATMUL_DTYPE)   # (W*C, 3*W*C)
  a2 = _band_weights(w2_oihw, W).astype(MATMUL_DTYPE)

  # conv1 (+ BN1 partial statistics)
  z1, s1, ss1 = _conv_call(_conv1_kernel, (x_rows, a1), N, H, WC)
  scale1, shift1 = _bn_affine(s1, ss1, g1, b1, count, W, C)

  # BN1 + ReLU fused into conv2's input read (+ BN2 partial statistics)
  z2, s2, ss2 = _conv_call(_conv2_kernel, (z1, a2, scale1, shift1), N, H, WC)
  scale2, shift2 = _bn_affine(s2, ss2, g2, b2, count, W, C)

  # BN2 + residual add (identity = x, downsample=None) + ReLU
  act_spec = pl.BlockSpec((1, H, WC), lambda n: (n, 0, 0))
  vec_spec = pl.BlockSpec((1, WC), lambda n: (0, 0))
  out_rows = pl.pallas_call(
      _bn_add_relu_kernel,
      grid=(N,),
      in_specs=[act_spec, act_spec, vec_spec, vec_spec],
      out_specs=act_spec,
      out_shape=jax.ShapeDtypeStruct((N, H, WC), x_nchw.dtype),
      compiler_params=pltpu.CompilerParams(
          dimension_semantics=("parallel",)),
  )(z2, x_rows, scale2, shift2)

  return jnp.transpose(out_rows.reshape(N, H, W, C), (0, 3, 1, 2))


# ---------------------------------------------------------------------------
# Pure-JAX reference mirroring the PyTorch module (training-mode BN)
# ---------------------------------------------------------------------------
def basic_block_ref(x, w1, g1, b1, w2, g2, b2):
  def conv(v, w):
    return jax.lax.conv_general_dilated(
        v, w, window_strides=(1, 1), padding=((1, 1), (1, 1)),
        dimension_numbers=("NCHW", "OIHW", "NCHW"))

  def bn(v, g, b):
    mean = v.mean(axis=(0, 2, 3), keepdims=True)
    var = v.var(axis=(0, 2, 3), keepdims=True)  # biased variance
    return ((v - mean) / jnp.sqrt(var + EPS)
            * g.reshape(1, -1, 1, 1) + b.reshape(1, -1, 1, 1))

  out = jax.nn.relu(bn(conv(x, w1), g1, b1))
  out = bn(conv(out, w2), g2, b2)
  return jax.nn.relu(out + x)


if __name__ == "__main__":
  # Small shapes: inplanes = planes = 8, spatial 16x16 (W*C = 128 lane-dense),
  # stride=1, downsample=None.
  N, C, H, W = 2, 8, 16, 16
  key = jax.random.PRNGKey(0)
  kx, k1, k2, kg1, kb1, kg2, kb2 = jax.random.split(key, 7)

  x = jax.random.normal(kx, (N, C, H, W), jnp.float32)
  w1 = jax.random.normal(k1, (C, C, 3, 3), jnp.float32) * 0.1   # conv1 OIHW
  w2 = jax.random.normal(k2, (C, C, 3, 3), jnp.float32) * 0.1   # conv2 OIHW
  g1 = 1.0 + 0.1 * jax.random.normal(kg1, (C,), jnp.float32)    # bn1 gamma
  b1 = 0.1 * jax.random.normal(kb1, (C,), jnp.float32)          # bn1 beta
  g2 = 1.0 + 0.1 * jax.random.normal(kg2, (C,), jnp.float32)    # bn2 gamma
  b2 = 0.1 * jax.random.normal(kb2, (C,), jnp.float32)          # bn2 beta

  out = basic_block_pallas(x, w1, g1, b1, w2, g2, b2)
  out = jax.block_until_ready(out)

  ref = basic_block_ref(x, w1, g1, b1, w2, g2, b2)
  assert out.shape == ref.shape == (N, C, H, W)
  assert jnp.allclose(out, ref, rtol=1e-2, atol=1e-2), (
      float(jnp.max(jnp.abs(out - ref))))

  print("KERNEL_OK")
</pallas_src>

<mosaic_0001>
module attributes {stable_mosaic.version = 11 : i64} {
  func.func @_conv1_kernel(%arg0: i32, %arg1: memref<1x16x128xf32, #tpu.memory_space<vmem>>, %arg2: memref<128x384xf32, #tpu.memory_space<vmem>>, %arg3: memref<1x16x128xf32, #tpu.memory_space<vmem>>, %arg4: memref<1x1x128xf32, #tpu.memory_space<vmem>>, %arg5: memref<1x1x128xf32, #tpu.memory_space<vmem>>) attributes {dimension_semantics = [#tpu.dimension_semantics<parallel>], iteration_bounds = array<i64: 2>, scalar_prefetch = 0 : i64, scratch_operands = 0 : i64, tpu.core_type = #tpu.core_type<tc>, window_params = [{transform_indices = @transform_0, window_bounds = array<i64: 1, 16, 128>}, {pipeline_mode = #tpu.pipeline_mode<synchronous>, transform_indices = @transform_1, window_bounds = array<i64: 128, 384>}, {transform_indices = @transform_2, window_bounds = array<i64: 1, 16, 128>}, {transform_indices = @transform_3, window_bounds = array<i64: 1, 1, 128>}, {transform_indices = @transform_4, window_bounds = array<i64: 1, 1, 128>}]} {
    %c0 = arith.constant 0 : index
    %c0_0 = arith.constant 0 : index
    %c0_1 = arith.constant 0 : index
    %0 = vector.load %arg1[%c0, %c0_0, %c0_1] : memref<1x16x128xf32, #tpu.memory_space<vmem>>, vector<1x16x128xf32>
    %1 = vector.shape_cast %0 : vector<1x16x128xf32> to vector<16x128xf32>
    %c0_2 = arith.constant 0 : index
    %c0_3 = arith.constant 0 : index
    %2 = vector.load %arg2[%c0_2, %c0_3] : memref<128x384xf32, #tpu.memory_space<vmem>>, vector<128x384xf32>
    %cst = arith.constant dense<0.000000e+00> : vector<16x384xf32>
    %3 = tpu.matmul %1, %2, %cst {dimension_numbers = #tpu.dot_dimension_numbers<[1], [0], [0], [1], [0, 0, 1, 1], [], []>} : vector<16x128xf32>, vector<128x384xf32>, vector<16x384xf32> -> vector<16x384xf32>
    %4 = vector.extract_strided_slice %3 {offsets = [0, 0], sizes = [16, 128], strides = [1, 1]} : vector<16x384xf32> to vector<16x128xf32>
    %5 = vector.extract_strided_slice %3 {offsets = [0, 128], sizes = [16, 128], strides = [1, 1]} : vector<16x384xf32> to vector<16x128xf32>
    %6 = vector.extract_strided_slice %3 {offsets = [0, 256], sizes = [16, 128], strides = [1, 1]} : vector<16x384xf32> to vector<16x128xf32>
    %cst_4 = arith.constant 0.000000e+00 : f32
    %7 = vector.broadcast %cst_4 : f32 to vector<1x128xf32>
    %8 = vector.extract_strided_slice %4 {offsets = [0, 0], sizes = [15, 128], strides = [1, 1]} : vector<16x128xf32> to vector<15x128xf32>
    %9 = tpu.concatenate %7, %8 in 0 : vector<1x128xf32>, vector<15x128xf32> -> vector<16x128xf32>
    %10 = arith.addf %5, %9 : vector<16x128xf32>
    %11 = vector.extract_strided_slice %6 {offsets = [1, 0], sizes = [15, 128], strides = [1, 1]} : vector<16x128xf32> to vector<15x128xf32>
    %12 = tpu.concatenate %11, %7 in 0 : vector<15x128xf32>, vector<1x128xf32> -> vector<16x128xf32>
    %13 = arith.addf %10, %12 : vector<16x128xf32>
    %c0_5 = arith.constant 0 : index
    %c0_6 = arith.constant 0 : index
    %c0_7 = arith.constant 0 : index
    %14 = vector.load %arg3[%c0_5, %c0_6, %c0_7] : memref<1x16x128xf32, #tpu.memory_space<vmem>>, vector<1x16x128xf32>
    %15 = vector.shape_cast %14 : vector<1x16x128xf32> to vector<16x128xf32>
    %16 = vector.shape_cast %13 : vector<16x128xf32> to vector<1x16x128xf32>
    tpu.vector_store %arg3[%c0_5, %c0_6, %c0_7], %16 {strides = array<i32>} : memref<1x16x128xf32, #tpu.memory_space<vmem>>, vector<1x16x128xf32>,
    %cst_8 = arith.constant dense<0.000000e+00> : vector<128xf32>
    %17 = vector.multi_reduction <add>, %13, %cst_8 [0] : vector<16x128xf32> to vector<128xf32>
    %18 = vector.shape_cast %17 : vector<128xf32> to vector<1x128xf32>
    %c0_9 = arith.constant 0 : index
    %c0_10 = arith.constant 0 : index
    %c0_11 = arith.constant 0 : index
    %19 = vector.load %arg4[%c0_9, %c0_10, %c0_11] : memref<1x1x128xf32, #tpu.memory_space<vmem>>, vector<1x1x128xf32>
    %20 = vector.shape_cast %19 : vector<1x1x128xf32> to vector<1x128xf32>
    %21 = vector.shape_cast %18 : vector<1x128xf32> to vector<1x1x128xf32>
    tpu.vector_store %arg4[%c0_9, %c0_10, %c0_11], %21 {strides = array<i32>} : memref<1x1x128xf32, #tpu.memory_space<vmem>>, vector<1x1x128xf32>,
    %22 = arith.mulf %13, %13 : vector<16x128xf32>
    %cst_12 = arith.constant dense<0.000000e+00> : vector<128xf32>
    %23 = vector.multi_reduction <add>, %22, %cst_12 [0] : vector<16x128xf32> to vector<128xf32>
    %24 = vector.shape_cast %23 : vector<128xf32> to vector<1x128xf32>
    %c0_13 = arith.constant 0 : index
    %c0_14 = arith.constant 0 : index
    %c0_15 = arith.constant 0 : index
    %25 = vector.load %arg5[%c0_13, %c0_14, %c0_15] : memref<1x1x128xf32, #tpu.memory_space<vmem>>, vector<1x1x128xf32>
    %26 = vector.shape_cast %25 : vector<1x1x128xf32> to vector<1x128xf32>
    %27 = vector.shape_cast %24 : vector<1x128xf32> to vector<1x1x128xf32>
    tpu.vector_store %arg5[%c0_13, %c0_14, %c0_15], %27 {strides = array<i32>} : memref<1x1x128xf32, #tpu.memory_space<vmem>>, vector<1x1x128xf32>,
    return
  }
  func.func @transform_0(%arg0: i32) -> (i32, i32, i32) {
    %c0_i32 = arith.constant 0 : i32
    %c0_i32_0 = arith.constant 0 : i32
    %c0_i32_1 = arith.constant 0 : i32
    return %arg0, %c0_i32, %c0_i32_0 : i32, i32, i32
  }
  func.func @transform_1(%arg0: i32) -> (i32, i32) {
    %c0_i32 = arith.constant 0 : i32
    %c0_i32_0 = arith.constant 0 : i32
    %c0_i32_1 = arith.constant 0 : i32
    return %c0_i32, %c0_i32_0 : i32, i32
  }
  func.func @transform_2(%arg0: i32) -> (i32, i32, i32) {
    %c0_i32 = arith.constant 0 : i32
    %c0_i32_0 = arith.constant 0 : i32
    %c0_i32_1 = arith.constant 0 : i32
    return %arg0, %c0_i32, %c0_i32_0 : i32, i32, i32
  }
  func.func @transform_3(%arg0: i32) -> (i32, i32, i32) {
    %c0_i32 = arith.constant 0 : i32
    %c0_i32_0 = arith.constant 0 : i32
    %c0_i32_1 = arith.constant 0 : i32
    return %arg0, %c0_i32, %c0_i32_0 : i32, i32, i32
  }
  func.func @transform_4(%arg0: i32) -> (i32, i32, i32) {
    %c0_i32 = arith.constant 0 : i32
    %c0_i32_0 = arith.constant 0 : i32
    %c0_i32_1 = arith.constant 0 : i32
    return %arg0, %c0_i32, %c0_i32_0 : i32, i32, i32
  }
}

module attributes {stable_mosaic.version = 11 : i64} {
  func.func @_conv2_kernel(%arg0: i32, %arg1: memref<1x16x128xf32, #tpu.memory_space<vmem>>, %arg2: memref<128x384xf32, #tpu.memory_space<vmem>>, %arg3: memref<1x128xf32, #tpu.memory_space<vmem>>, %arg4: memref<1x128xf32, #tpu.memory_space<vmem>>, %arg5: memref<1x16x128xf32, #tpu.memory_space<vmem>>, %arg6: memref<1x1x128xf32, #tpu.memory_space<vmem>>, %arg7: memref<1x1x128xf32, #tpu.memory_space<vmem>>) attributes {dimension_semantics = [#tpu.dimension_semantics<parallel>], iteration_bounds = array<i64: 2>, scalar_prefetch = 0 : i64, scratch_operands = 0 : i64, tpu.core_type = #tpu.core_type<tc>, window_params = [{transform_indices = @transform_0, window_bounds = array<i64: 1, 16, 128>}, {pipeline_mode = #tpu.pipeline_mode<synchronous>, transform_indices = @transform_1, window_bounds = array<i64: 128, 384>}, {pipeline_mode = #tpu.pipeline_mode<synchronous>, transform_indices = @transform_2, window_bounds = array<i64: 1, 128>}, {pipeline_mode = #tpu.pipeline_mode<synchronous>, transform_indices = @transform_3, window_bounds = array<i64: 1, 128>}, {transform_indices = @transform_4, window_bounds = array<i64: 1, 16, 128>}, {transform_indices = @transform_5, window_bounds = array<i64: 1, 1, 128>}, {transform_indices = @transform_6, window_bounds = array<i64: 1, 1, 128>}]} {
    %c0 = arith.constant 0 : index
    %c0_0 = arith.constant 0 : index
    %c0_1 = arith.constant 0 : index
    %0 = vector.load %arg1[%c0, %c0_0, %c0_1] : memref<1x16x128xf32, #tpu.memory_space<vmem>>, vector<1x16x128xf32>
    %1 = vector.shape_cast %0 : vector<1x16x128xf32> to vector<16x128xf32>
    %c0_2 = arith.constant 0 : index
    %c0_3 = arith.constant 0 : index
    %2 = vector.load %arg3[%c0_2, %c0_3] : memref<1x128xf32, #tpu.memory_space<vmem>>, vector<1x128xf32>
    %3 = vector.broadcast %2 : vector<1x128xf32> to vector<16x128xf32>
    %4 = arith.mulf %1, %3 : vector<16x128xf32>
    %c0_4 = arith.constant 0 : index
    %c0_5 = arith.constant 0 : index
    %5 = vector.load %arg4[%c0_4, %c0_5] : memref<1x128xf32, #tpu.memory_space<vmem>>, vector<1x128xf32>
    %6 = vector.broadcast %5 : vector<1x128xf32> to vector<16x128xf32>
    %7 = arith.addf %4, %6 : vector<16x128xf32>
    %cst = arith.constant 0.000000e+00 : f32
    %8 = vector.broadcast %cst : f32 to vector<16x128xf32>
    %9 = arith.maximumf %7, %8 : vector<16x128xf32>
    %c0_6 = arith.constant 0 : index
    %c0_7 = arith.constant 0 : index
    %10 = vector.load %arg2[%c0_6, %c0_7] : memref<128x384xf32, #tpu.memory_space<vmem>>, vector<128x384xf32>
    %cst_8 = arith.constant dense<0.000000e+00> : vector<16x384xf32>
    %11 = tpu.matmul %9, %10, %cst_8 {dimension_numbers = #tpu.dot_dimension_numbers<[1], [0], [0], [1], [0, 0, 1, 1], [], []>} : vector<16x128xf32>, vector<128x384xf32>, vector<16x384xf32> -> vector<16x384xf32>
    %12 = vector.extract_strided_slice %11 {offsets = [0, 0], sizes = [16, 128], strides = [1, 1]} : vector<16x384xf32> to vector<16x128xf32>
    %13 = vector.extract_strided_slice %11 {offsets = [0, 128], sizes = [16, 128], strides = [1, 1]} : vector<16x384xf32> to vector<16x128xf32>
    %14 = vector.extract_strided_slice %11 {offsets = [0, 256], sizes = [16, 128], strides = [1, 1]} : vector<16x384xf32> to vector<16x128xf32>
    %cst_9 = arith.constant 0.000000e+00 : f32
    %15 = vector.broadcast %cst_9 : f32 to vector<1x128xf32>
    %16 = vector.extract_strided_slice %12 {offsets = [0, 0], sizes = [15, 128], strides = [1, 1]} : vector<16x128xf32> to vector<15x128xf32>
    %17 = tpu.concatenate %15, %16 in 0 : vector<1x128xf32>, vector<15x128xf32> -> vector<16x128xf32>
    %18 = arith.addf %13, %17 : vector<16x128xf32>
    %19 = vector.extract_strided_slice %14 {offsets = [1, 0], sizes = [15, 128], strides = [1, 1]} : vector<16x128xf32> to vector<15x128xf32>
    %20 = tpu.concatenate %19, %15 in 0 : vector<15x128xf32>, vector<1x128xf32> -> vector<16x128xf32>
    %21 = arith.addf %18, %20 : vector<16x128xf32>
    %c0_10 = arith.constant 0 : index
    %c0_11 = arith.constant 0 : index
    %c0_12 = arith.constant 0 : index
    %22 = vector.load %arg5[%c0_10, %c0_11, %c0_12] : memref<1x16x128xf32, #tpu.memory_space<vmem>>, vector<1x16x128xf32>
    %23 = vector.shape_cast %22 : vector<1x16x128xf32> to vector<16x128xf32>
    %24 = vector.shape_cast %21 : vector<16x128xf32> to vector<1x16x128xf32>
    tpu.vector_store %arg5[%c0_10, %c0_11, %c0_12], %24 {strides = array<i32>} : memref<1x16x128xf32, #tpu.memory_space<vmem>>, vector<1x16x128xf32>,
    %cst_13 = arith.constant dense<0.000000e+00> : vector<128xf32>
    %25 = vector.multi_reduction <add>, %21, %cst_13 [0] : vector<16x128xf32> to vector<128xf32>
    %26 = vector.shape_cast %25 : vector<128xf32> to vector<1x128xf32>
    %c0_14 = arith.constant 0 : index
    %c0_15 = arith.constant 0 : index
    %c0_16 = arith.constant 0 : index
    %27 = vector.load %arg6[%c0_14, %c0_15, %c0_16] : memref<1x1x128xf32, #tpu.memory_space<vmem>>, vector<1x1x128xf32>
    %28 = vector.shape_cast %27 : vector<1x1x128xf32> to vector<1x128xf32>
    %29 = vector.shape_cast %26 : vector<1x128xf32> to vector<1x1x128xf32>
    tpu.vector_store %arg6[%c0_14, %c0_15, %c0_16], %29 {strides = array<i32>} : memref<1x1x128xf32, #tpu.memory_space<vmem>>, vector<1x1x128xf32>,
    %30 = arith.mulf %21, %21 : vector<16x128xf32>
    %cst_17 = arith.constant dense<0.000000e+00> : vector<128xf32>
    %31 = vector.multi_reduction <add>, %30, %cst_17 [0] : vector<16x128xf32> to vector<128xf32>
    %32 = vector.shape_cast %31 : vector<128xf32> to vector<1x128xf32>
    %c0_18 = arith.constant 0 : index
    %c0_19 = arith.constant 0 : index
    %c0_20 = arith.constant 0 : index
    %33 = vector.load %arg7[%c0_18, %c0_19, %c0_20] : memref<1x1x128xf32, #tpu.memory_space<vmem>>, vector<1x1x128xf32>
    %34 = vector.shape_cast %33 : vector<1x1x128xf32> to vector<1x128xf32>
    %35 = vector.shape_cast %32 : vector<1x128xf32> to vector<1x1x128xf32>
    tpu.vector_store %arg7[%c0_18, %c0_19, %c0_20], %35 {strides = array<i32>} : memref<1x1x128xf32, #tpu.memory_space<vmem>>, vector<1x1x128xf32>,
    return
  }
  func.func @transform_0(%arg0: i32) -> (i32, i32, i32) {
    %c0_i32 = arith.constant 0 : i32
    %c0_i32_0 = arith.constant 0 : i32
    %c0_i32_1 = arith.constant 0 : i32
    return %arg0, %c0_i32, %c0_i32_0 : i32, i32, i32
  }
  func.func @transform_1(%arg0: i32) -> (i32, i32) {
    %c0_i32 = arith.constant 0 : i32
    %c0_i32_0 = arith.constant 0 : i32
    %c0_i32_1 = arith.constant 0 : i32
    return %c0_i32, %c0_i32_0 : i32, i32
  }
  func.func @transform_2(%arg0: i32) -> (i32, i32) {
    %c0_i32 = arith.constant 0 : i32
    %c0_i32_0 = arith.constant 0 : i32
    %c0_i32_1 = arith.constant 0 : i32
    return %c0_i32, %c0_i32_0 : i32, i32
  }
  func.func @transform_3(%arg0: i32) -> (i32, i32) {
    %c0_i32 = arith.constant 0 : i32
    %c0_i32_0 = arith.constant 0 : i32
    %c0_i32_1 = arith.constant 0 : i32
    return %c0_i32, %c0_i32_0 : i32, i32
  }
  func.func @transform_4(%arg0: i32) -> (i32, i32, i32) {
    %c0_i32 = arith.constant 0 : i32
    %c0_i32_0 = arith.constant 0 : i32
    %c0_i32_1 = arith.constant 0 : i32
    return %arg0, %c0_i32, %c0_i32_0 : i32, i32, i32
  }
  func.func @transform_5(%arg0: i32) -> (i32, i32, i32) {
    %c0_i32 = arith.constant 0 : i32
    %c0_i32_0 = arith.constant 0 : i32
    %c0_i32_1 = arith.constant 0 : i32
    return %arg0, %c0_i32, %c0_i32_0 : i32, i32, i32
  }
  func.func @transform_6(%arg0: i32) -> (i32, i32, i32) {
    %c0_i32 = arith.constant 0 : i32
    %c0_i32_0 = arith.constant 0 : i32
    %c0_i32_1 = arith.constant 0 : i32
    return %arg0, %c0_i32, %c0_i32_0 : i32, i32, i32
  }
}

module attributes {stable_mosaic.version = 11 : i64} {
  func.func @_bn_add_relu_kernel(%arg0: i32, %arg1: memref<1x16x128xf32, #tpu.memory_space<vmem>>, %arg2: memref<1x16x128xf32, #tpu.memory_space<vmem>>, %arg3: memref<1x128xf32, #tpu.memory_space<vmem>>, %arg4: memref<1x128xf32, #tpu.memory_space<vmem>>, %arg5: memref<1x16x128xf32, #tpu.memory_space<vmem>>) attributes {dimension_semantics = [#tpu.dimension_semantics<parallel>], iteration_bounds = array<i64: 2>, scalar_prefetch = 0 : i64, scratch_operands = 0 : i64, tpu.core_type = #tpu.core_type<tc>, window_params = [{transform_indices = @transform_0, window_bounds = array<i64: 1, 16, 128>}, {transform_indices = @transform_1, window_bounds = array<i64: 1, 16, 128>}, {pipeline_mode = #tpu.pipeline_mode<synchronous>, transform_indices = @transform_2, window_bounds = array<i64: 1, 128>}, {pipeline_mode = #tpu.pipeline_mode<synchronous>, transform_indices = @transform_3, window_bounds = array<i64: 1, 128>}, {transform_indices = @transform_4, window_bounds = array<i64: 1, 16, 128>}]} {
    %c0 = arith.constant 0 : index
    %c0_0 = arith.constant 0 : index
    %c0_1 = arith.constant 0 : index
    %0 = vector.load %arg1[%c0, %c0_0, %c0_1] : memref<1x16x128xf32, #tpu.memory_space<vmem>>, vector<1x16x128xf32>
    %1 = vector.shape_cast %0 : vector<1x16x128xf32> to vector<16x128xf32>
    %c0_2 = arith.constant 0 : index
    %c0_3 = arith.constant 0 : index
    %2 = vector.load %arg3[%c0_2, %c0_3] : memref<1x128xf32, #tpu.memory_space<vmem>>, vector<1x128xf32>
    %3 = vector.broadcast %2 : vector<1x128xf32> to vector<16x128xf32>
    %4 = arith.mulf %1, %3 : vector<16x128xf32>
    %c0_4 = arith.constant 0 : index
    %c0_5 = arith.constant 0 : index
    %5 = vector.load %arg4[%c0_4, %c0_5] : memref<1x128xf32, #tpu.memory_space<vmem>>, vector<1x128xf32>
    %6 = vector.broadcast %5 : vector<1x128xf32> to vector<16x128xf32>
    %7 = arith.addf %4, %6 : vector<16x128xf32>
    %c0_6 = arith.constant 0 : index
    %c0_7 = arith.constant 0 : index
    %c0_8 = arith.constant 0 : index
    %8 = vector.load %arg2[%c0_6, %c0_7, %c0_8] : memref<1x16x128xf32, #tpu.memory_space<vmem>>, vector<1x16x128xf32>
    %9 = vector.shape_cast %8 : vector<1x16x128xf32> to vector<16x128xf32>
    %10 = arith.addf %7, %9 : vector<16x128xf32>
    %cst = arith.constant 0.000000e+00 : f32
    %11 = vector.broadcast %cst : f32 to vector<16x128xf32>
    %12 = arith.maximumf %10, %11 : vector<16x128xf32>
    %c0_9 = arith.constant 0 : index
    %c0_10 = arith.constant 0 : index
    %c0_11 = arith.constant 0 : index
    %13 = vector.load %arg5[%c0_9, %c0_10, %c0_11] : memref<1x16x128xf32, #tpu.memory_space<vmem>>, vector<1x16x128xf32>
    %14 = vector.shape_cast %13 : vector<1x16x128xf32> to vector<16x128xf32>
    %15 = vector.shape_cast %12 : vector<16x128xf32> to vector<1x16x128xf32>
    tpu.vector_store %arg5[%c0_9, %c0_10, %c0_11], %15 {strides = array<i32>} : memref<1x16x128xf32, #tpu.memory_space<vmem>>, vector<1x16x128xf32>,
    return
  }
  func.func @transform_0(%arg0: i32) -> (i32, i32, i32) {
    %c0_i32 = arith.constant 0 : i32
    %c0_i32_0 = arith.constant 0 : i32
    %c0_i32_1 = arith.constant 0 : i32
    return %arg0, %c0_i32, %c0_i32_0 : i32, i32, i32
  }
  func.func @transform_1(%arg0: i32) -> (i32, i32, i32) {
    %c0_i32 = arith.constant 0 : i32
    %c0_i32_0 = arith.constant 0 : i32
    %c0_i32_1 = arith.constant 0 : i32
    return %arg0, %c0_i32, %c0_i32_0 : i32, i32, i32
  }
  func.func @transform_2(%arg0: i32) -> (i32, i32) {
    %c0_i32 = arith.constant 0 : i32
    %c0_i32_0 = arith.constant 0 : i32
    %c0_i32_1 = arith.constant 0 : i32
    return %c0_i32, %c0_i32_0 : i32, i32
  }
  func.func @transform_3(%arg0: i32) -> (i32, i32) {
    %c0_i32 = arith.constant 0 : i32
    %c0_i32_0 = arith.constant 0 : i32
    %c0_i32_1 = arith.constant 0 : i32
    return %c0_i32, %c0_i32_0 : i32, i32
  }
  func.func @transform_4(%arg0: i32) -> (i32, i32, i32) {
    %c0_i32 = arith.constant 0 : i32
    %c0_i32_0 = arith.constant 0 : i32
    %c0_i32_1 = arith.constant 0 : i32
    return %arg0, %c0_i32, %c0_i32_0 : i32, i32, i32
  }
}

</mosaic_0001>

<bundles_post_ra>
// kernel: tile.23
= control target key start
LH: loop header
LB: loop body
LE: loop exit
PB: predicated region body
PF: predicated region fallthrough
CT: control target
= control target key end

     0   :  { %s28_s0 = inlined_call_operand.vmem [shape: f32[8], index: 0, kind: input, shape index: {}]   ;;  %s29_s1 = inlined_call_operand.vmem [shape: f32[16,8], index: 1, kind: output, shape index: {}]  }
   0x1   :  { %v4_v0 = vld [vmem:[%s28_s0] ss:$0 sm:$0xff] }
   0x2   :  { %5 = vst [vmem:[%s29_s1] sm:$0xff] %v4_v0 }
   0x3   :  { %8 = vst [vmem:[%s29_s1 + $0x8] sm:$0xff] %v4_v0 }

// kernel: tile.24
= control target key start
LH: loop header
LB: loop body
LE: loop exit
PB: predicated region body
PF: predicated region fallthrough
CT: control target
= control target key end

     0   :  { %s131_s10 = smov 120   ;;  %s132_s11 = smov 104   ;;  %vm3_vm0 = vcmask 64512   ;;  %vm9_vm1 = vcmask 1048512   ;;  %vm15_vm2 = vcmask 982912   ;;  %vm21_vm3 = vcmask 917312   ;;  %s207_s0 = inlined_call_operand.vmem [shape: f32[16,8], index: 0, kind: input, shape index: {}]   ;;  %s208_s1 = inlined_call_operand.vmem [shape: f32[1,128], index: 1, kind: output, shape index: {}]  }
   0x1   :  { %v101_v0 = vld [vmem:[%s207_s0 + $0xf] sm:$0x1]   ;;  %v103_v1 = vld [vmem:[%s207_s0 + $0xd] sm:$0x1]   ;;  %v105_v2 = vld [vmem:[%s207_s0 + $0xb] sm:$0x1]  }
   0x2   :  { %7 = vrot.lane.b32.xlu0 %v101_v0, %s131_s10  ;;  %19 = vrot.lane.b32.xlu1 %v103_v1, %s132_s11  ;;  %s133_s14 = smov 88   ;;  %v102_v3 = vld [vmem:[%s207_s0 + $0xe] sm:$0x1]   ;;  %v104_v4 = vld [vmem:[%s207_s0 + $0xc] sm:$0x1]   ;;  %s134_s19 = smov 112  }
   0x3   :  { %31 = vrot.lane.b32.xlu2 %v105_v2, %s133_s14  ;;  %s135_s20 = smov 96   ;;  %v106_v5 = vld [vmem:[%s207_s0 + $0xa] sm:$0x1]   ;;  %s136_s23 = smov 80   ;;  %v107_v6 = vld [vmem:[%s207_s0 + $0x9] sm:$0x1]  }
   0x4   :  { %v108_v7 = vld [vmem:[%s207_s0 + $0x8] sm:$0x1]   ;;  %s137_s28 = smov 72   ;;  %s138_s29 = smov 64   ;;  %v109_v8 = vld [vmem:[%s207_s0 + $0x7] sm:$0x1]  }
   0x5   :  { %s139_s3 = smov 56   ;;  %v110_v9 = vld [vmem:[%s207_s0 + $0x6] sm:$0x1]   ;;  %v111_v10 = vld [vmem:[%s207_s0 + $0x5] sm:$0x1]   ;;  %s140_s8 = smov 48  }
   0x6   :  { %s141_s9 = smov 40   ;;  %v112_v11 = vld [vmem:[%s207_s0 + $0x4] sm:$0x1]   ;;  %s142_s12 = smov 32   ;;  %v113_v12 = vld [vmem:[%s207_s0 + $0x3] sm:$0x1]  }
   0x7   :  { %v114_v13 = vld [vmem:[%s207_s0 + $0x2] sm:$0x1]   ;;  %s143_s17 = smov 24   ;;  %s144_s18 = smov 16   ;;  %v115_v14 = vld [vmem:[%s207_s0 + $0x1] sm:$0x1]  }
   0x8   :  { %s145_s21 = smov 8   ;;  %v2_v15 = vld [vmem:[%s207_s0] sm:$0x1]   ;;  %vm27_vm4 = vcmask 851712   ;;  %vm33_vm5 = vcmask 786112   ;;  %vm39_vm6 = vcmask 720512  }
   0x9   :  { %4 = vst.msk [vmem:[#allocation0] sm:$0x1] %vm3_vm0, %v2_v15   ;;  %vm45_vm7 = vcmask 654912   ;;  %vm51_vm8 = vcmask 589312   ;;  %vm57_vm9 = vcmask 523712   ;;  %vm63_vm10 = vcmask 458112  }
   0xa   :  { %13 = vrot.lane.b32.xlu0 %v102_v3, %s134_s19  ;;  %25 = vrot.lane.b32.xlu1 %v104_v4, %s135_s20  ;;  %vm69_vm11 = vcmask 392512   ;;  %vm75_vm12 = vcmask 326912   ;;  %vm81_vm13 = vcmask 261312   ;;  %vm87_vm14 = vcmask 195712  }
   0xb   :  { %37 = vrot.lane.b32.xlu2 %v106_v5, %s136_s23  ;;  %vm93_vm15 = vcmask 130112  }
  0x12   :  { %43 = vrot.lane.b32.xlu0 %v107_v6, %s137_s28  ;;  %49 = vrot.lane.b32.xlu1 %v108_v7, %s138_s29 }
  0x13   :  { %55 = vrot.lane.b32.xlu2 %v109_v8, %s139_s3 }
  0x1a   :  { %61 = vrot.lane.b32.xlu0 %v110_v9, %s140_s8  ;;  %67 = vrot.lane.b32.xlu1 %v111_v10, %s141_s9 }
  0x1b   :  { %73 = vrot.lane.b32.xlu2 %v112_v11, %s142_s12 }
  0x22   :  { %79 = vrot.lane.b32.xlu0 %v113_v12, %s143_s17  ;;  %85 = vrot.lane.b32.xlu1 %v114_v13, %s144_s18 }
  0x23   :  { %91 = vrot.lane.b32.xlu2 %v115_v14, %s145_s21 }
  0x5d   :  { %v32_v16 = vpop.permute.xlu2 %31  }
  0x65   :  { %v38_v17 = vpop.permute.xlu2 %37  }
  0x6d   :  { %v56_v18 = vpop.permute.xlu2 %55  }
  0x74   :  { %v8_v19 = vpop.permute.xlu0 %7   ;;  %v20_v20 = vpop.permute.xlu1 %19  }
  0x75   :  { %10 = vst.msk [vmem:[#allocation0] sm:$0x1] %vm9_vm1, %v8_v19   ;;  %v74_v21 = vpop.permute.xlu2 %73  }
  0x7c   :  { %v14_v22 = vpop.permute.xlu0 %13   ;;  %v26_v23 = vpop.permute.xlu1 %25  }
  0x7d   :  { %16 = vst.msk [vmem:[#allocation0] sm:$0x1] %vm15_vm2, %v14_v22   ;;  %v92_v24 = vpop.permute.xlu2 %91  }
  0x7e   :  { %22 = vst.msk [vmem:[#allocation0] sm:$0x1] %vm21_vm3, %v20_v20  }
  0x7f   :  { %28 = vst.msk [vmem:[#allocation0] sm:$0x1] %vm27_vm4, %v26_v23  }
  0x80   :  { %34 = vst.msk [vmem:[#allocation0] sm:$0x1] %vm33_vm5, %v32_v16  }
  0x81   :  { %40 = vst.msk [vmem:[#allocation0] sm:$0x1] %vm39_vm6, %v38_v17  }
  0x84   :  { %v44_v25 = vpop.permute.xlu0 %43   ;;  %v50_v26 = vpop.permute.xlu1 %49  }
  0x85   :  { %46 = vst.msk [vmem:[#allocation0] sm:$0x1] %vm45_vm7, %v44_v25  }
  0x86   :  { %52 = vst.msk [vmem:[#allocation0] sm:$0x1] %vm51_vm8, %v50_v26  }
  0x87   :  { %58 = vst.msk [vmem:[#allocation0] sm:$0x1] %vm57_vm9, %v56_v18  }
  0x8c   :  { %v62_v27 = vpop.permute.xlu0 %61   ;;  %v68_v28 = vpop.permute.xlu1 %67  }
  0x8d   :  { %64 = vst.msk [vmem:[#allocation0] sm:$0x1] %vm63_vm10, %v62_v27  }
  0x8e   :  { %70 = vst.msk [vmem:[#allocation0] sm:$0x1] %vm69_vm11, %v68_v28  }
  0x8f   :  { %76 = vst.msk [vmem:[#allocation0] sm:$0x1] %vm75_vm12, %v74_v21  }
  0x94   :  { %v80_v29 = vpop.permute.xlu0 %79   ;;  %v86_v30 = vpop.permute.xlu1 %85  }
  0x95   :  { %82 = vst.msk [vmem:[#allocation0] sm:$0x1] %vm81_vm13, %v80_v29  }
  0x96   :  { %88 = vst.msk [vmem:[#allocation0] sm:$0x1] %vm87_vm14, %v86_v30  }
  0x97   :  { %94 = vst.msk [vmem:[#allocation0] sm:$0x1] %vm93_vm15, %v92_v24  }
  0x9e   :  { %v97_v31 = vld [vmem:[#allocation0] sm:$0x1] }
  0x9f   :  { %100 = vst [vmem:[%s208_s1] sm:$0x1] %v97_v31 }

// kernel: basic_block_pallas.3
= control target key start
LH: loop header
LB: loop body
LE: loop exit
PB: predicated region body
PF: predicated region fallthrough
CT: control target
= control target key end

     0   :  { %s551_s15 = smov 0   ;;  %s737_s0 = inlined_call_operand.vmem [shape: f32[2,16,128], index: 0, kind: input, shape index: {}]   ;;  %s738_s1 = inlined_call_operand.vmem [shape: f32[128,384], index: 1, kind: input, shape index: {}]   ;;  %s739_s2 = inlined_call_operand.vmem [shape: f32[2,16,128], index: 2, kind: output, shape index: {0}]   ;;  %s740_s3 = inlined_call_operand.vmem [shape: f32[2,1,128], index: 3, kind: output, shape index: {1}]   ;;  %s741_s4 = inlined_call_operand.vmem [shape: f32[2,1,128], index: 4, kind: output, shape index: {2}]  }
   0x1 LB: > { %s481_s16 = sadd.s32 4294967295, %s524_s15   ;;  %p485_p0 = scmp.ge.s32.totalorder %s524_s15, 1  ;;  %s524_s15 = sphi %s551_s15, %s15_s15  }
   0x2   : > { %p167_p1 = scmp.lt.s32.totalorder %s524_s15, 3 }
   0x4   : > { %p168_p2 = pnand %p485_p0, %p167_p1 }
   0x5   : > { %p639_p3 = scmp.lt.s32.totalorder (!%p168_p2), %s481_s16, 1 }
   0x6   : > { %171 = sbr.rel (%p168_p2) target bundleno = 205 (0xcd), region = 28 }
   0xb   : > { %v264_v0 = vld [vmem:[%s738_s1 + $0x178] sm:$0xff]  ;;  %v261_v1 = vld [vmem:[%s738_s1 + $0x160] sm:$0xff]  ;;  %v262_v2 = vld [vmem:[%s738_s1 + $0x168] sm:$0xff]  ;;  %s744_s16 = smov (!%p639_p3, %s481_s16), 1  ;;  %vm336_vm0 = vcmask 1040384   ;;  %vm347_vm1 = vcmask 1046528  }
   0xc   : > { %311 = vmatpush.msra.mxu2 %v264_v0  ;;  %265 = vmatpush.msra.mxu0 %v262_v2  ;;  %v259_v3 = vld [vmem:[%s738_s1 + $0x150] sm:$0xff]  ;;  %v258_v4 = vld [vmem:[%s738_s1 + $0x148] sm:$0xff]  ;;  %v256_v6 = vld [vmem:[%s738_s1 + $0x138] sm:$0xff]  ;;  %s492_s22 = sshll.u32 %s744_s16, 4  ;;  %s211_s27 = scalar_lea.vmem %s740_s3, %s744_s16 }
   0xd   : > { %494 = vmatpush.msra.mxu3 %v262_v2  ;;  %v263_v5 = vld [vmem:[%s738_s1 + $0x170] sm:$0xff]  ;;  %v260_v7 = vld [vmem:[%s738_s1 + $0x158] sm:$0xff]  ;;  %v253_v9 = vld [vmem:[%s738_s1 + $0x120] sm:$0xff]  ;;  %s203_s7 = scalar_lea.vmem %s737_s0, %s492_s22  ;;  %s208_s25 = scalar_lea.vmem %s739_s2, %s492_s22 }
   0xe   : > { %312 = vmatpush.msra.mxu2 %v261_v1  ;;  %266 = vmatpush.msra.mxu0 %v259_v3  ;;  %v255_v8 = vld [vmem:[%s738_s1 + $0x130] sm:$0xff]  ;;  %v257_v10 = vld [vmem:[%s738_s1 + $0x140] sm:$0xff]  ;;  %v252_v11 = vld [vmem:[%s738_s1 + $0x118] sm:$0xff]  ;;  %s214_s30 = scalar_lea.vmem %s741_s4, %s744_s16 }
   0xf   : > { %288 = vmatpush.msra.mxu1 %v263_v5  ;;  %495 = vmatpush.msra.mxu3 %v259_v3  ;;  %v250_v12 = vld [vmem:[%s738_s1 + $0x108] sm:$0xff]  ;;  %v249_v14 = vld [vmem:[%s738_s1 + $0x100] sm:$0xff]  ;;  %v247_v15 = vld [vmem:[%s738_s1 + $0xf0] sm:$0xff] }
  0x10   : > { %313 = vmatpush.msra.mxu2 %v258_v4  ;;  %267 = vmatpush.msra.mxu0 %v256_v6  ;;  %v254_v13 = vld [vmem:[%s738_s1 + $0x128] sm:$0xff]  ;;  %v251_v16 = vld [vmem:[%s738_s1 + $0x110] sm:$0xff]  ;;  %v244_v18 = vld [vmem:[%s738_s1 + $0xd8] sm:$0xff] }
  0x11   : > { %289 = vmatpush.msra.mxu1 %v260_v7  ;;  %496 = vmatpush.msra.mxu3 %v256_v6  ;;  %v246_v17 = vld [vmem:[%s738_s1 + $0xe8] sm:$0xff]  ;;  %v248_v19 = vld [vmem:[%s738_s1 + $0xf8] sm:$0xff]  ;;  %v243_v20 = vld [vmem:[%s738_s1 + $0xd0] sm:$0xff] }
  0x12   : > { %314 = vmatpush.msra.mxu2 %v255_v8  ;;  %268 = vmatpush.msra.mxu0 %v253_v9  ;;  %v241_v21 = vld [vmem:[%s738_s1 + $0xc0] sm:$0xff]  ;;  %v240_v23 = vld [vmem:[%s738_s1 + $0xb8] sm:$0xff]  ;;  %v238_v24 = vld [vmem:[%s738_s1 + $0xa8] sm:$0xff] }
  0x13   : > { %290 = vmatpush.msra.mxu1 %v257_v10  ;;  %497 = vmatpush.msra.mxu3 %v253_v9  ;;  %v245_v22 = vld [vmem:[%s738_s1 + $0xe0] sm:$0xff]  ;;  %v242_v25 = vld [vmem:[%s738_s1 + $0xc8] sm:$0xff]  ;;  %v235_v27 = vld [vmem:[%s738_s1 + $0x90] sm:$0xff] }
  0x14   : > { %315 = vmatpush.msra.mxu2 %v252_v11  ;;  %269 = vmatpush.msra.mxu0 %v250_v12  ;;  %v237_v26 = vld [vmem:[%s738_s1 + $0xa0] sm:$0xff]  ;;  %v239_v28 = vld [vmem:[%s738_s1 + $0xb0] sm:$0xff]  ;;  %v234_v29 = vld [vmem:[%s738_s1 + $0x88] sm:$0xff] }
  0x15   : > { %291 = vmatpush.msra.mxu1 %v254_v13  ;;  %498 = vmatpush.msra.mxu3 %v250_v12  ;;  %v232_v30 = vld [vmem:[%s738_s1 + $0x78] sm:$0xff]  ;;  %v231_v32 = vld [vmem:[%s738_s1 + $0x70] sm:$0xff]  ;;  %v229_v33 = vld [vmem:[%s738_s1 + $0x60] sm:$0xff] }
  0x16   : > { %316 = vmatpush.msra.mxu2 %v249_v14  ;;  %270 = vmatpush.msra.mxu0 %v247_v15  ;;  %v236_v31 = vld [vmem:[%s738_s1 + $0x98] sm:$0xff]  ;;  %v233_v34 = vld [vmem:[%s738_s1 + $0x80] sm:$0xff]  ;;  %v226_v36 = vld [vmem:[%s738_s1 + $0x48] sm:$0xff] }
  0x17   : > { %292 = vmatpush.msra.mxu1 %v251_v16  ;;  %499 = vmatpush.msra.mxu3 %v247_v15  ;;  %v228_v35 = vld [vmem:[%s738_s1 + $0x58] sm:$0xff]  ;;  %v230_v37 = vld [vmem:[%s738_s1 + $0x68] sm:$0xff]  ;;  %v225_v38 = vld [vmem:[%s738_s1 + $0x40] sm:$0xff] }
  0x18   : > { %317 = vmatpush.msra.mxu2 %v246_v17  ;;  %271 = vmatpush.msra.mxu0 %v244_v18  ;;  %v223_v39 = vld [vmem:[%s738_s1 + $0x30] sm:$0xff]  ;;  %v222_v41 = vld [vmem:[%s738_s1 + $0x28] sm:$0xff]  ;;  %v220_v42 = vld [vmem:[%s738_s1 + $0x18] sm:$0xff] }
  0x19   : > { %293 = vmatpush.msra.mxu1 %v248_v19  ;;  %500 = vmatpush.msra.mxu3 %v244_v18  ;;  %v227_v40 = vld [vmem:[%s738_s1 + $0x50] sm:$0xff]  ;;  %v224_v43 = vld [vmem:[%s738_s1 + $0x38] sm:$0xff]  ;;  %v217_v45 = vld [vmem:[%s738_s1] sm:$0xff] }
  0x1a   : > { %318 = vmatpush.msra.mxu2 %v243_v20  ;;  %272 = vmatpush.msra.mxu0 %v241_v21  ;;  %v219_v44 = vld [vmem:[%s738_s1 + $0x10] sm:$0xff]  ;;  %v215_v46 = vld [vmem:[%s203_s7] sm:$0xff]  ;;  %v216_v48 = vld [vmem:[%s203_s7 + $0x8] sm:$0xff] }
  0x1b   : > { %294 = vmatpush.msra.mxu1 %v245_v22  ;;  %501 = vmatpush.msra.mxu3 %v241_v21  ;;  %v221_v47 = vld [vmem:[%s738_s1 + $0x20] sm:$0xff]  ;;  %v218_v49 = vld [vmem:[%s738_s1 + $0x8] sm:$0xff] }
  0x1c   : > { %319 = vmatpush.msra.mxu2 %v240_v23  ;;  %273 = vmatpush.msra.mxu0 %v238_v24 }
  0x1d   : > { %295 = vmatpush.msra.mxu1 %v242_v25  ;;  %502 = vmatpush.msra.mxu3 %v238_v24 }
  0x1e   : > { %320 = vmatpush.msra.mxu2 %v237_v26  ;;  %274 = vmatpush.msra.mxu0 %v235_v27 }
  0x1f   : > { %296 = vmatpush.msra.mxu1 %v239_v28  ;;  %503 = vmatpush.msra.mxu3 %v235_v27 }
  0x20   : > { %321 = vmatpush.msra.mxu2 %v234_v29  ;;  %275 = vmatpush.msra.mxu0 %v232_v30 }
  0x21   : > { %297 = vmatpush.msra.mxu1 %v236_v31  ;;  %504 = vmatpush.msra.mxu3 %v232_v30 }
  0x22   : > { %322 = vmatpush.msra.mxu2 %v231_v32  ;;  %276 = vmatpush.msra.mxu0 %v229_v33 }
  0x23   : > { %298 = vmatpush.msra.mxu1 %v233_v34  ;;  %505 = vmatpush.msra.mxu3 %v229_v33 }
  0x24   : > { %323 = vmatpush.msra.mxu2 %v228_v35  ;;  %277 = vmatpush.msra.mxu0 %v226_v36 }
  0x25   : > { %299 = vmatpush.msra.mxu1 %v230_v37  ;;  %506 = vmatpush.msra.mxu3 %v226_v36 }
  0x26   : > { %324 = vmatpush.msra.mxu2 %v225_v38  ;;  %278 = vmatpush.msra.mxu0 %v223_v39 }
  0x27   : > { %300 = vmatpush.msra.mxu1 %v227_v40  ;;  %507 = vmatpush.msra.mxu3 %v223_v39 }
  0x28   : > { %325 = vmatpush.msra.mxu2 %v222_v41  ;;  %279 = vmatpush.msra.mxu0 %v220_v42 }
  0x29   : > { %301 = vmatpush.msra.mxu1 %v224_v43  ;;  %508 = vmatpush.msra.mxu3 %v220_v42 }
  0x2a   : > { %326 = vmatpush.msra.mxu2 %v219_v44  ;;  %280 = vmatpush.msra.mxu0 %v217_v45 }
  0x2b   : > { %327 = vmatmul.f32.vlgmr.msra.gmra.mxu2 %v215_v46  ;;  %281 = vmatmul.f32.vlgmr.msra.gmra.mxu0 %v215_v46 }
  0x2c   : > { %302 = vmatpush.msra.mxu1 %v221_v47  ;;  %509 = vmatpush.msra.mxu3 %v217_v45 }
  0x2d   : > { %284 = vmatmul.f32.vlgmr.msra.gmra.mxu3 %v216_v48 }
  0x2e   : > { %303 = vmatpush.msra.mxu1 %v218_v49 }
  0x2f   : > { %304 = vmatmul.f32.vlgmr.msra.gmra.mxu1 %v215_v46 }
  0x33   : > { %330 = vmatmul.f32.gmra.mxu2 %v216_v48 }
  0x37   : > { %307 = vmatmul.f32.gmra.mxu1 %v216_v48 }
  0xa8   : > { %v282_v51 = vpop.f32.mrf.mxu0 }
  0xa9   : > { %v337_v54 = vrot.slane %v282_v51, 7 }
  0xab   : > { %v342_v58 = vsel %vm336_vm0, 0.0, %v337_v54 }
  0xac   : > { %v305_v50 = vpop.f32.mrf.mxu1 }
  0xad   : > { %v343_v63 = vadd.f32 %v342_v58, %v305_v50 }
  0xae   : > { %v328_v52 = vpop.f32.mrf.mxu2 }
  0xaf   : > { %v348_v61 = vrot.slane %v328_v52, 1 }
  0xb0   : > { %v285_v53 = vpop.f32.mrf.mxu3 }
  0xb1   : > { %v338_v55 = vrot.slane %v285_v53, 7 }
  0xb3   : > { %v339_v56 = vsel %vm336_vm0, %v337_v54, %v338_v55 }
  0xb4   : > { %v308_v57 = vpop.f32.mrf.mxu1 }
  0xb5   : > { %v344_v60 = vadd.f32 %v339_v56, %v308_v57 }
  0xb6   : > { %v331_v59 = vpop.f32.mrf.mxu2 }
  0xb7   : > { %v349_v62 = vrot.slane %v331_v59, 1 }
  0xb9   : > { %v350_v0 = vsel %vm347_vm1, %v348_v61, %v349_v62  ;;  %v353_v1 = vsel %vm347_vm1, %v349_v62, 0.0 }
  0xba   : > { %v354_v2 = vadd.f32 %v350_v0, %v343_v63  ;;  %v355_v3 = vadd.f32 %v353_v1, %v344_v60 }
  0xbc   : > { %356 = vst [vmem:[%s208_s25] sm:$0xff] %v354_v2  ;;  %v366_v4 = vmul.f32 %v354_v2, %v354_v2  ;;  %v358_v5 = vadd.f32 %v355_v3, %v354_v2  ;;  %v367_v6 = vmul.f32 %v355_v3, %v355_v3 }
  0xbd   : > { %357 = vst [vmem:[%s208_s25 + $0x8] sm:$0xff] %v355_v3 }
  0xbe   : > { %v359_v7 = vrot.slane %v358_v5, 4  ;;  %v368_v8 = vadd.f32 %v367_v6, %v366_v4 }
  0xc0   : > { %v360_v9 = vadd.f32 %v359_v7, %v358_v5  ;;  %v369_v10 = vrot.slane %v368_v8, 4 }
  0xc2   : > { %v361_v11 = vrot.slane %v360_v9, 2  ;;  %v370_v12 = vadd.f32 %v369_v10, %v368_v8 }
  0xc4   : > { %v362_v13 = vadd.f32 %v361_v11, %v360_v9  ;;  %v371_v14 = vrot.slane %v370_v12, 2 }
  0xc6   : > { %v363_v15 = vrot.slane %v362_v13, 1  ;;  %v372_v16 = vadd.f32 %v371_v14, %v370_v12 }
  0xc8   : > { %v364_v17 = vadd.f32 %v363_v15, %v362_v13  ;;  %v373_v18 = vrot.slane %v372_v16, 1 }
  0xca   : > { %365 = vst [vmem:[%s211_s27] sm:$0x1] %v364_v17  ;;  %v374_v19 = vadd.f32 %v373_v18, %v372_v16 }
  0xcc   : > { %375 = vst [vmem:[%s214_s30] sm:$0x1] %v374_v19 }
  0xcd PF: > { %s15_s15 = sadd.s32 1, %s524_s15  }
  0xce   : > { %p12_p4 = scmp.ge.s32.totalorder %s15_s15, 4  }
  0xd0   :  { %14 = sbr.rel (!%p12_p4) target bundleno = 1 (0x1), region = 82 }

// kernel: basic_block_pallas.4
= control target key start
LH: loop header
LB: loop body
LE: loop exit
PB: predicated region body
PF: predicated region fallthrough
CT: control target
= control target key end

     0   :  { %s631_s21 = smov 0   ;;  %s823_s0 = inlined_call_operand.vmem [shape: f32[2,16,128], index: 0, kind: input, shape index: {}]   ;;  %s824_s1 = inlined_call_operand.vmem [shape: f32[128,384], index: 1, kind: input, shape index: {}]   ;;  %s825_s2 = inlined_call_operand.vmem [shape: f32[1,128], index: 2, kind: input, shape index: {}]   ;;  %s826_s3 = inlined_call_operand.vmem [shape: f32[1,128], index: 3, kind: input, shape index: {}]   ;;  %s827_s4 = inlined_call_operand.vmem [shape: f32[2,16,128], index: 4, kind: output, shape index: {0}]   ;;  %s828_s5 = inlined_call_operand.vmem [shape: f32[2,1,128], index: 5, kind: output, shape index: {1}]   ;;  %s829_s6 = inlined_call_operand.vmem [shape: f32[2,1,128], index: 6, kind: output, shape index: {2}]  }
   0x1 LB: > { %s549_s22 = sadd.s32 4294967295, %s594_s21   ;;  %p553_p0 = scmp.ge.s32.totalorder %s594_s21, 1  ;;  %s594_s21 = sphi %s631_s21, %s17_s21  }
   0x2   : > { %p217_p1 = scmp.lt.s32.totalorder %s594_s21, 3 }
   0x4   : > { %p218_p2 = pnand %p553_p0, %p217_p1 }
   0x5   : > { %p665_p3 = scmp.lt.s32.totalorder (!%p218_p2), %s549_s22, 1 }
   0x6   : > { %221 = sbr.rel (%p218_p2) target bundleno = 205 (0xcd), region = 36 }
   0xb   : > { %v332_v0 = vld [vmem:[%s824_s1 + $0x178] sm:$0xff]  ;;  %v329_v1 = vld [vmem:[%s824_s1 + $0x160] sm:$0xff]  ;;  %v330_v2 = vld [vmem:[%s824_s1 + $0x168] sm:$0xff]  ;;  %s832_s22 = smov (!%p665_p3, %s549_s22), 1  ;;  %vm404_vm0 = vcmask 1040384   ;;  %vm415_vm1 = vcmask 1046528  }
   0xc   : > { %379 = vmatpush.msra.mxu2 %v332_v0  ;;  %333 = vmatpush.msra.mxu0 %v330_v2  ;;  %v327_v3 = vld [vmem:[%s824_s1 + $0x150] sm:$0xff]  ;;  %v326_v4 = vld [vmem:[%s824_s1 + $0x148] sm:$0xff]  ;;  %v324_v6 = vld [vmem:[%s824_s1 + $0x138] sm:$0xff]  ;;  %s560_s18 = sshll.u32 %s832_s22, 4  ;;  %s265_s25 = scalar_lea.vmem %s828_s5, %s832_s22 }
   0xd   : > { %562 = vmatpush.msra.mxu3 %v330_v2  ;;  %v331_v5 = vld [vmem:[%s824_s1 + $0x170] sm:$0xff]  ;;  %v328_v7 = vld [vmem:[%s824_s1 + $0x158] sm:$0xff]  ;;  %v321_v9 = vld [vmem:[%s824_s1 + $0x120] sm:$0xff]  ;;  %s257_s9 = scalar_lea.vmem %s823_s0, %s560_s18  ;;  %s262_s23 = scalar_lea.vmem %s827_s4, %s560_s18 }
   0xe   : > { %380 = vmatpush.msra.mxu2 %v329_v1  ;;  %334 = vmatpush.msra.mxu0 %v327_v3  ;;  %v323_v8 = vld [vmem:[%s824_s1 + $0x130] sm:$0xff]  ;;  %v325_v10 = vld [vmem:[%s824_s1 + $0x140] sm:$0xff]  ;;  %v320_v11 = vld [vmem:[%s824_s1 + $0x118] sm:$0xff]  ;;  %s268_s28 = scalar_lea.vmem %s829_s6, %s832_s22 }
   0xf   : > { %356 = vmatpush.msra.mxu1 %v331_v5  ;;  %563 = vmatpush.msra.mxu3 %v327_v3  ;;  %v318_v12 = vld [vmem:[%s824_s1 + $0x108] sm:$0xff]  ;;  %v317_v14 = vld [vmem:[%s824_s1 + $0x100] sm:$0xff]  ;;  %v315_v15 = vld [vmem:[%s824_s1 + $0xf0] sm:$0xff] }
  0x10   : > { %381 = vmatpush.msra.mxu2 %v326_v4  ;;  %335 = vmatpush.msra.mxu0 %v324_v6  ;;  %v322_v13 = vld [vmem:[%s824_s1 + $0x128] sm:$0xff]  ;;  %v319_v16 = vld [vmem:[%s824_s1 + $0x110] sm:$0xff]  ;;  %v312_v18 = vld [vmem:[%s824_s1 + $0xd8] sm:$0xff] }
  0x11   : > { %357 = vmatpush.msra.mxu1 %v328_v7  ;;  %564 = vmatpush.msra.mxu3 %v324_v6  ;;  %v314_v17 = vld [vmem:[%s824_s1 + $0xe8] sm:$0xff]  ;;  %v316_v19 = vld [vmem:[%s824_s1 + $0xf8] sm:$0xff]  ;;  %v311_v20 = vld [vmem:[%s824_s1 + $0xd0] sm:$0xff] }
  0x12   : > { %382 = vmatpush.msra.mxu2 %v323_v8  ;;  %336 = vmatpush.msra.mxu0 %v321_v9  ;;  %v309_v21 = vld [vmem:[%s824_s1 + $0xc0] sm:$0xff]  ;;  %v308_v23 = vld [vmem:[%s824_s1 + $0xb8] sm:$0xff]  ;;  %v306_v24 = vld [vmem:[%s824_s1 + $0xa8] sm:$0xff] }
  0x13   : > { %358 = vmatpush.msra.mxu1 %v325_v10  ;;  %565 = vmatpush.msra.mxu3 %v321_v9  ;;  %v313_v22 = vld [vmem:[%s824_s1 + $0xe0] sm:$0xff]  ;;  %v310_v25 = vld [vmem:[%s824_s1 + $0xc8] sm:$0xff]  ;;  %v303_v27 = vld [vmem:[%s824_s1 + $0x90] sm:$0xff] }
  0x14   : > { %383 = vmatpush.msra.mxu2 %v320_v11  ;;  %337 = vmatpush.msra.mxu0 %v318_v12  ;;  %v305_v26 = vld [vmem:[%s824_s1 + $0xa0] sm:$0xff]  ;;  %v307_v29 = vld [vmem:[%s824_s1 + $0xb0] sm:$0xff]  ;;  %v302_v31 = vld [vmem:[%s824_s1 + $0x88] sm:$0xff] }
  0x15   : > { %359 = vmatpush.msra.mxu1 %v322_v13  ;;  %566 = vmatpush.msra.mxu3 %v318_v12  ;;  %v586_v28 = vld [vmem:[%s825_s2] ss:$0 sm:$0xff]  ;;  %v300_v32 = vld [vmem:[%s824_s1 + $0x78] sm:$0xff]  ;;  %v270_v34 = vld [vmem:[%s257_s9 + $0x8] sm:$0xff] }
  0x16   : > { %384 = vmatpush.msra.mxu2 %v317_v14  ;;  %338 = vmatpush.msra.mxu0 %v315_v15  ;;  %v269_v30 = vld [vmem:[%s257_s9] sm:$0xff]  ;;  %v304_v33 = vld [vmem:[%s824_s1 + $0x98] sm:$0xff]  ;;  %v299_v35 = vld [vmem:[%s824_s1 + $0x70] sm:$0xff]  ;;  %v276_v42 = vmul.f32 %v586_v28, %v270_v34 }
  0x17   : > { %360 = vmatpush.msra.mxu1 %v319_v16  ;;  %567 = vmatpush.msra.mxu3 %v315_v15  ;;  %v297_v36 = vld [vmem:[%s824_s1 + $0x60] sm:$0xff]  ;;  %v275_v37 = vmul.f32 %v586_v28, %v269_v30  ;;  %v296_v40 = vld [vmem:[%s824_s1 + $0x58] sm:$0xff]  ;;  %v294_v41 = vld [vmem:[%s824_s1 + $0x48] sm:$0xff] }
  0x18   : > { %385 = vmatpush.msra.mxu2 %v314_v17  ;;  %339 = vmatpush.msra.mxu0 %v312_v18  ;;  %v587_v38 = vld [vmem:[%s826_s3] ss:$0 sm:$0xff]  ;;  %v298_v43 = vld [vmem:[%s824_s1 + $0x68] sm:$0xff]  ;;  %v291_v45 = vld [vmem:[%s824_s1 + $0x30] sm:$0xff] }
  0x19   : > { %361 = vmatpush.msra.mxu1 %v316_v19  ;;  %568 = vmatpush.msra.mxu3 %v312_v18  ;;  %v301_v39 = vld [vmem:[%s824_s1 + $0x80] sm:$0xff]  ;;  %v281_v46 = vadd.f32 %v587_v38, %v275_v37  ;;  %v295_v47 = vld [vmem:[%s824_s1 + $0x50] sm:$0xff]  ;;  %v290_v48 = vld [vmem:[%s824_s1 + $0x28] sm:$0xff]  ;;  %v282_v50 = vadd.f32 %v587_v38, %v276_v42 }
  0x1a   : > { %386 = vmatpush.msra.mxu2 %v311_v20  ;;  %340 = vmatpush.msra.mxu0 %v309_v21  ;;  %v293_v44 = vld [vmem:[%s824_s1 + $0x40] sm:$0xff]  ;;  %v288_v49 = vld [vmem:[%s824_s1 + $0x18] sm:$0xff]  ;;  %v287_v52 = vld [vmem:[%s824_s1 + $0x10] sm:$0xff] }
  0x1b   : > { %362 = vmatpush.msra.mxu1 %v313_v22  ;;  %569 = vmatpush.msra.mxu3 %v309_v21  ;;  %v292_v51 = vld [vmem:[%s824_s1 + $0x38] sm:$0xff]  ;;  %v283_v53 = vmax.f32 %v281_v46, 0.0  ;;  %v285_v54 = vld [vmem:[%s824_s1] sm:$0xff]  ;;  %v284_v56 = vmax.f32 %v282_v50, 0.0  ;;  %v286_v57 = vld [vmem:[%s824_s1 + $0x8] sm:$0xff] }
  0x1c   : > { %387 = vmatpush.msra.mxu2 %v308_v23  ;;  %341 = vmatpush.msra.mxu0 %v306_v24  ;;  %v289_v55 = vld [vmem:[%s824_s1 + $0x20] sm:$0xff] }
  0x1d   : > { %363 = vmatpush.msra.mxu1 %v310_v25  ;;  %570 = vmatpush.msra.mxu3 %v306_v24 }
  0x1e   : > { %388 = vmatpush.msra.mxu2 %v305_v26  ;;  %342 = vmatpush.msra.mxu0 %v303_v27 }
  0x1f   : > { %364 = vmatpush.msra.mxu1 %v307_v29  ;;  %571 = vmatpush.msra.mxu3 %v303_v27 }
  0x20   : > { %389 = vmatpush.msra.mxu2 %v302_v31  ;;  %343 = vmatpush.msra.mxu0 %v300_v32 }
  0x21   : > { %365 = vmatpush.msra.mxu1 %v304_v33  ;;  %572 = vmatpush.msra.mxu3 %v300_v32 }
  0x22   : > { %390 = vmatpush.msra.mxu2 %v299_v35  ;;  %344 = vmatpush.msra.mxu0 %v297_v36 }
  0x23   : > { %366 = vmatpush.msra.mxu1 %v301_v39  ;;  %573 = vmatpush.msra.mxu3 %v297_v36 }
  0x24   : > { %391 = vmatpush.msra.mxu2 %v296_v40  ;;  %345 = vmatpush.msra.mxu0 %v294_v41 }
  0x25   : > { %367 = vmatpush.msra.mxu1 %v298_v43  ;;  %574 = vmatpush.msra.mxu3 %v294_v41 }
  0x26   : > { %392 = vmatpush.msra.mxu2 %v293_v44  ;;  %346 = vmatpush.msra.mxu0 %v291_v45 }
  0x27   : > { %368 = vmatpush.msra.mxu1 %v295_v47  ;;  %575 = vmatpush.msra.mxu3 %v291_v45 }
  0x28   : > { %393 = vmatpush.msra.mxu2 %v290_v48  ;;  %347 = vmatpush.msra.mxu0 %v288_v49 }
  0x29   : > { %369 = vmatpush.msra.mxu1 %v292_v51  ;;  %576 = vmatpush.msra.mxu3 %v288_v49 }
  0x2a   : > { %394 = vmatpush.msra.mxu2 %v287_v52  ;;  %348 = vmatpush.msra.mxu0 %v285_v54 }
  0x2b   : > { %395 = vmatmul.f32.vlgmr.msra.gmra.mxu2 %v283_v53  ;;  %349 = vmatmul.f32.vlgmr.msra.gmra.mxu0 %v283_v53 }
  0x2c   : > { %370 = vmatpush.msra.mxu1 %v289_v55  ;;  %577 = vmatpush.msra.mxu3 %v285_v54 }
  0x2d   : > { %352 = vmatmul.f32.vlgmr.msra.gmra.mxu3 %v284_v56 }
  0x2e   : > { %371 = vmatpush.msra.mxu1 %v286_v57 }
  0x2f   : > { %372 = vmatmul.f32.vlgmr.msra.gmra.mxu1 %v283_v53 }
  0x33   : > { %398 = vmatmul.f32.gmra.mxu2 %v284_v56 }
  0x37   : > { %375 = vmatmul.f32.gmra.mxu1 %v284_v56 }
  0xa8   : > { %v350_v59 = vpop.f32.mrf.mxu0 }
  0xa9   : > { %v405_v62 = vrot.slane %v350_v59, 7 }
  0xab   : > { %v410_v2 = vsel %vm404_vm0, 0.0, %v405_v62 }
  0xac   : > { %v373_v58 = vpop.f32.mrf.mxu1 }
  0xad   : > { %v411_v7 = vadd.f32 %v410_v2, %v373_v58 }
  0xae   : > { %v396_v60 = vpop.f32.mrf.mxu2 }
  0xaf   : > { %v416_v5 = vrot.slane %v396_v60, 1 }
  0xb0   : > { %v353_v61 = vpop.f32.mrf.mxu3 }
  0xb1   : > { %v406_v63 = vrot.slane %v353_v61, 7 }
  0xb3   : > { %v407_v0 = vsel %vm404_vm0, %v405_v62, %v406_v63 }
  0xb4   : > { %v376_v1 = vpop.f32.mrf.mxu1 }
  0xb5   : > { %v412_v4 = vadd.f32 %v407_v0, %v376_v1 }
  0xb6   : > { %v399_v3 = vpop.f32.mrf.mxu2 }
  0xb7   : > { %v417_v6 = vrot.slane %v399_v3, 1 }
  0xb9   : > { %v418_v8 = vsel %vm415_vm1, %v416_v5, %v417_v6  ;;  %v421_v9 = vsel %vm415_vm1, %v417_v6, 0.0 }
  0xba   : > { %v422_v10 = vadd.f32 %v418_v8, %v411_v7  ;;  %v423_v11 = vadd.f32 %v421_v9, %v412_v4 }
  0xbc   : > { %v434_v12 = vmul.f32 %v422_v10, %v422_v10  ;;  %424 = vst [vmem:[%s262_s23] sm:$0xff] %v422_v10  ;;  %v426_v13 = vadd.f32 %v423_v11, %v422_v10  ;;  %v435_v14 = vmul.f32 %v423_v11, %v423_v11 }
  0xbd   : > { %425 = vst [vmem:[%s262_s23 + $0x8] sm:$0xff] %v423_v11 }
  0xbe   : > { %v427_v15 = vrot.slane %v426_v13, 4  ;;  %v436_v16 = vadd.f32 %v435_v14, %v434_v12 }
  0xc0   : > { %v428_v17 = vadd.f32 %v427_v15, %v426_v13  ;;  %v437_v18 = vrot.slane %v436_v16, 4 }
  0xc2   : > { %v429_v19 = vrot.slane %v428_v17, 2  ;;  %v438_v20 = vadd.f32 %v437_v18, %v436_v16 }
  0xc4   : > { %v430_v21 = vadd.f32 %v429_v19, %v428_v17  ;;  %v439_v22 = vrot.slane %v438_v20, 2 }
  0xc6   : > { %v431_v23 = vrot.slane %v430_v21, 1  ;;  %v440_v24 = vadd.f32 %v439_v22, %v438_v20 }
  0xc8   : > { %v432_v25 = vadd.f32 %v431_v23, %v430_v21  ;;  %v441_v26 = vrot.slane %v440_v24, 1 }
  0xca   : > { %433 = vst [vmem:[%s265_s25] sm:$0x1] %v432_v25  ;;  %v442_v27 = vadd.f32 %v441_v26, %v440_v24 }
  0xcc   : > { %443 = vst [vmem:[%s268_s28] sm:$0x1] %v442_v27 }
  0xcd PF: > { %s17_s21 = sadd.s32 1, %s594_s21  }
  0xce   : > { %p14_p4 = scmp.ge.s32.totalorder %s17_s21, 4  }
  0xd0   :  { %16 = sbr.rel (!%p14_p4) target bundleno = 1 (0x1), region = 90 }

// kernel: basic_block_pallas.5
= control target key start
LH: loop header
LB: loop body
LE: loop exit
PB: predicated region body
PF: predicated region fallthrough
CT: control target
= control target key end

     0   :  { %s366_s15 = smov 0   ;;  %s392_s0 = inlined_call_operand.vmem [shape: f32[2,16,128], index: 0, kind: input, shape index: {}]   ;;  %s393_s1 = inlined_call_operand.vmem [shape: f32[2,16,128], index: 1, kind: input, shape index: {}]   ;;  %s394_s2 = inlined_call_operand.vmem [shape: f32[1,128], index: 2, kind: input, shape index: {}]   ;;  %s395_s3 = inlined_call_operand.vmem [shape: f32[1,128], index: 3, kind: input, shape index: {}]   ;;  %s396_s4 = inlined_call_operand.vmem [shape: f32[2,16,128], index: 4, kind: output, shape index: {}]  }
   0x1 LB: > { %s307_s16 = sadd.s32 4294967295, %s339_s15   ;;  %p311_p0 = scmp.ge.s32.totalorder %s339_s15, 1  ;;  %s339_s15 = sphi %s366_s15, %s14_s15  }
   0x2   : > { %p172_p1 = scmp.lt.s32.totalorder %s339_s15, 3 }
   0x4   : > { %p173_p2 = pnand %p311_p0, %p172_p1 }
   0x5   : > { %p203_p3 = scmp.lt.s32.totalorder (!%p173_p2), %s307_s16, 1 }
   0x6   : > { %176 = sbr.rel (%p173_p2) target bundleno = 25 (0x19), region = 36 }
   0xb   : > { %s398_s16 = smov (!%p203_p3, %s307_s16), 1  ;;  %v331_v0 = vld [vmem:[%s394_s2] ss:$0 sm:$0xff] }
   0xc   : > { %s320_s19 = sshll.u32 %s398_s16, 4  ;;  %v332_v1 = vld [vmem:[%s395_s3] ss:$0 sm:$0xff] }
   0xd   : > { %s207_s22 = scalar_lea.vmem %s392_s0, %s320_s19  ;;  %s212_s25 = scalar_lea.vmem %s393_s1, %s320_s19 }
   0xe   : > { %v218_v2 = vld [vmem:[%s207_s22] sm:$0xff]  ;;  %v219_v3 = vld [vmem:[%s207_s22 + $0x8] sm:$0xff]  ;;  %s217_s30 = scalar_lea.vmem %s396_s4, %s320_s19 }
   0xf   : > { %v224_v4 = vmul.f32 %v331_v0, %v218_v2  ;;  %v225_v5 = vmul.f32 %v331_v0, %v219_v3  ;;  %v232_v6 = vld [vmem:[%s212_s25] sm:$0xff]  ;;  %v233_v7 = vld [vmem:[%s212_s25 + $0x8] sm:$0xff] }
  0x11   : > { %v230_v8 = vadd.f32 %v332_v1, %v224_v4  ;;  %v231_v9 = vadd.f32 %v332_v1, %v225_v5 }
  0x13   : > { %v234_v10 = vadd.f32 %v232_v6, %v230_v8  ;;  %v235_v11 = vadd.f32 %v233_v7, %v231_v9 }
  0x15   : > { %v236_v12 = vmax.f32 %v234_v10, 0.0  ;;  %v237_v13 = vmax.f32 %v235_v11, 0.0 }
  0x17   : > { %238 = vst [vmem:[%s217_s30] sm:$0xff] %v236_v12 }
  0x18   : > { %239 = vst [vmem:[%s217_s30 + $0x8] sm:$0xff] %v237_v13 }
  0x19 PF: > { %s14_s15 = sadd.s32 1, %s339_s15  }
  0x1a   : > { %p11_p4 = scmp.ge.s32.totalorder %s14_s15, 4  }
  0x1c   :  { %13 = sbr.rel (!%p11_p4) target bundleno = 1 (0x1), region = 69 }

</bundles_post_ra>
